<compile_context>
chip_gen: v7x
topology: tpu7x:2x2x1
jax: 0.10.0
libtpu: 0.0.40
codegen_flags: <defaults>
</compile_context>

<pallas_src>
import functools

import jax
import jax.numpy as jnp
from jax.experimental import pallas as pl
from jax.experimental.pallas import tpu as pltpu


def _round_up(x: int, m: int) -> int:
    return ((x + m - 1) // m) * m


def _vmem_budget_bytes() -> int:
    """Per-generation VMEM budget (leaves headroom for compiler scratch)."""
    cap = 64 * 1024 * 1024  # conservative default = v7x per-TC VMEM
    try:
        info = pltpu.get_tpu_info()
        cap = int(getattr(info, "vmem_capacity_bytes", cap))
    except Exception:
        pass
    # 3/4 of physical, capped at 96 MiB (v5e/v6e are 128 MiB parts).
    return min((cap * 3) // 4, 96 * 1024 * 1024)


def _resident_kernel(x_ref, w_ref, p_ref, res_ref, o_ref, *, eps):
    """Full-K contraction per M tile; weight stays resident in VMEM."""
    y = jnp.dot(x_ref[...], w_ref[...], preferred_element_type=jnp.float32)
    y = y + p_ref[0:1, :]                        # bias (1, N) broadcast
    # TODO(synk): training-mode dropout not implemented (identity at inference).
    y = y + res_ref[...].astype(jnp.float32)     # residual add
    mean = jnp.mean(y, axis=-1, keepdims=True)
    c = y - mean
    var = jnp.mean(c * c, axis=-1, keepdims=True)
    out = c * jax.lax.rsqrt(var + eps) * p_ref[1:2, :] + p_ref[2:3, :]
    o_ref[...] = out.astype(o_ref.dtype)


def _tiled_kernel(x_ref, w_ref, p_ref, res_ref, o_ref, *scratch, eps):
    """K-tiled fallback; accumulates into o_ref when it is f32, else scratch."""
    acc_ref = scratch[0] if scratch else o_ref
    k = pl.program_id(1)

    @pl.when(k == 0)
    def _init():
        acc_ref[...] = jnp.zeros_like(acc_ref)

    acc_ref[...] += jnp.dot(x_ref[...], w_ref[...],
                            preferred_element_type=jnp.float32)

    @pl.when(k == pl.num_programs(1) - 1)
    def _epilogue():
        y = acc_ref[...].astype(jnp.float32) + p_ref[0:1, :]
        y = y + res_ref[...].astype(jnp.float32)
        mean = jnp.mean(y, axis=-1, keepdims=True)
        c = y - mean
        var = jnp.mean(c * c, axis=-1, keepdims=True)
        out = c * jax.lax.rsqrt(var + eps) * p_ref[1:2, :] + p_ref[2:3, :]
        o_ref[...] = out.astype(o_ref.dtype)


def _plan(M, K, N, xb, wb, rb, ob, acc_in_out, budget):
    """Pick ("resident", tm, None) or ("tiled", tm, tk) from the VMEM budget."""
    M8 = _round_up(max(M, 1), 8)
    p_bytes = 2 * 8 * N * 4  # (3, N) params pad to 8 sublanes, double-buffered

    # Path A: full weight resident, no K grid axis.
    for tm in (1024, 512, 256, 128):
        tm_eff = min(tm, M8)
        need = (2 * tm_eff * K * xb      # x tile (double-buffered)
                + 2 * K * N * wb         # full weight (conservatively counted 2x)
                + 2 * tm_eff * N * rb    # residual tile
                + 2 * tm_eff * N * ob    # output tile
                + p_bytes)
        if need <= budget:
            # Keep >= 2 M tiles when there is enough work (v7x second TC).
            if tm_eff >= M8 and M8 >= 256:
                tm_eff = max(128, _round_up((M8 + 1) // 2, 8))
            return "resident", tm_eff, None
        if tm_eff <= 128:
            break

    # Path B: tile K with a resident accumulator.
    K128 = _round_up(K, 128)
    for tm in (512, 256, 128):
        tm_eff = min(tm, M8)
        for tk in (2048, 1024, 512, 256, 128):
            tk_eff = min(tk, K128)
            acc_b = 0 if acc_in_out else tm_eff * N * 4
            need = (2 * tm_eff * tk_eff * xb
                    + 2 * tk_eff * N * wb
                    + 2 * tm_eff * N * rb
                    + 2 * tm_eff * N * ob
                    + acc_b + p_bytes)
            if need <= budget:
                return "tiled", tm_eff, tk_eff
    return "tiled", min(128, M8), min(128, K128)


def layout_output(
    hidden_states,   # (B, S, K) K = intermediate_size
    input_tensor,    # (B, S, N) N = hidden_size (residual)
    weight,          # (K, N)    transposed PyTorch Linear weight
    bias,            # (N,)
    gamma,           # (N,)      LayerNorm weight
    beta,            # (N,)      LayerNorm bias
    *,
    eps: float = 1e-12,
    use_bf16_matmul: bool = True,
):
    B, S, K = hidden_states.shape
    Kw, N = weight.shape
    assert Kw == K, (Kw, K)
    M = B * S
    out_dtype = hidden_states.dtype

    x2d = hidden_states.reshape(M, K)
    res2d = input_tensor.reshape(M, N)
    # Pack bias / gamma / beta into a single (3, N) f32 operand (one small DMA).
    params = jnp.stack(
        [bias.astype(jnp.float32), gamma.astype(jnp.float32),
         beta.astype(jnp.float32)], axis=0)

    if use_bf16_matmul:
        # Cast MXU operands in the wrapper: native-rate bf16 matmul and half
        # the operand HBM->VMEM bytes; accumulation stays f32 in the kernel.
        x2d = x2d.astype(jnp.bfloat16)
        w = weight.astype(jnp.bfloat16)
    else:
        w = weight

    xb = jnp.dtype(x2d.dtype).itemsize
    wb = jnp.dtype(w.dtype).itemsize
    rb = jnp.dtype(res2d.dtype).itemsize
    ob = jnp.dtype(out_dtype).itemsize
    acc_in_out = jnp.dtype(out_dtype) == jnp.dtype(jnp.float32)

    budget = _vmem_budget_bytes()
    mode, tm, tk = _plan(M, K, N, xb, wb, rb, ob, acc_in_out, budget)

    # Pad M (and K in the tiled path) so the grid divides evenly. Padded rows
    # are sliced off afterwards; padded K columns contribute zeros to the dot.
    M_pad = _round_up(M, tm)
    if M_pad != M:
        x2d = jnp.pad(x2d, ((0, M_pad - M), (0, 0)))
        res2d = jnp.pad(res2d, ((0, M_pad - M), (0, 0)))

    if mode == "resident":
        grid = (M_pad // tm,)
        cost = pl.CostEstimate(
            flops=2 * M_pad * K * N + 10 * M_pad * N,
            transcendentals=M_pad,  # one rsqrt per row
            bytes_accessed=(M_pad * K * xb + K * N * wb
                            + M_pad * N * rb + M_pad * N * ob + 3 * N * 4),
        )
        out2d = pl.pallas_call(
            functools.partial(_resident_kernel, eps=eps),
            out_shape=jax.ShapeDtypeStruct((M_pad, N), out_dtype),
            grid=grid,
            in_specs=[
                pl.BlockSpec((tm, K), lambda i: (i, 0)),   # x tile
                pl.BlockSpec((K, N), lambda i: (0, 0)),    # full weight, resident
                pl.BlockSpec((3, N), lambda i: (0, 0)),    # bias/gamma/beta
                pl.BlockSpec((tm, N), lambda i: (i, 0)),   # residual tile
            ],
            out_specs=pl.BlockSpec((tm, N), lambda i: (i, 0)),
            compiler_params=pltpu.CompilerParams(
                dimension_semantics=("parallel",),
                vmem_limit_bytes=budget,
            ),
            cost_estimate=cost,
        )(x2d, w, params, res2d)
    else:
        K_pad = _round_up(K, tk)
        if K_pad != K:
            x2d = jnp.pad(x2d, ((0, 0), (0, K_pad - K)))
            w = jnp.pad(w, ((0, K_pad - K), (0, 0)))
        grid = (M_pad // tm, K_pad // tk)
        cost = pl.CostEstimate(
            flops=2 * M_pad * K_pad * N + 10 * M_pad * N,
            transcendentals=M_pad,
            bytes_accessed=(M_pad * K_pad * xb
                            + (M_pad // tm) * K_pad * N * wb  # weight re-stream
                            + M_pad * N * rb + M_pad * N * ob + 3 * N * 4),
        )
        scratch_shapes = [] if acc_in_out else [pltpu.VMEM((tm, N), jnp.float32)]
        out2d = pl.pallas_call(
            functools.partial(_tiled_kernel, eps=eps),
            out_shape=jax.ShapeDtypeStruct((M_pad, N), out_dtype),
            grid=grid,
            in_specs=[
                pl.BlockSpec((tm, tk), lambda i, k: (i, k)),  # x tile
                pl.BlockSpec((tk, N), lambda i, k: (k, 0)),   # weight K-slab
                pl.BlockSpec((3, N), lambda i, k: (0, 0)),    # bias/gamma/beta
                pl.BlockSpec((tm, N), lambda i, k: (i, 0)),   # residual tile
            ],
            out_specs=pl.BlockSpec((tm, N), lambda i, k: (i, 0)),
            scratch_shapes=scratch_shapes,
            compiler_params=pltpu.CompilerParams(
                dimension_semantics=("parallel", "arbitrary"),
                vmem_limit_bytes=budget,
            ),
            cost_estimate=cost,
        )(x2d, w, params, res2d)

    if M_pad != M:
        out2d = out2d[:M]
    return out2d.reshape(B, S, N)


if __name__ == "__main__":
    # Small shapes consistent with the module: batch=2, seq=8,
    # intermediate_size=64, hidden_size=32 (scaled-down config).
    batch, seq, hidden, intermediate = 2, 8, 32, 64
    layer_norm_eps = 1e-12
    initializer_range = 0.02

    key = jax.random.PRNGKey(0)
    kx, kres, kw, kb, kg, kbe = jax.random.split(key, 6)

    hidden_states = jax.random.normal(
        kx, (batch, seq, intermediate), dtype=jnp.float32)
    input_tensor = jax.random.normal(
        kres, (batch, seq, hidden), dtype=jnp.float32)
    # Dense: intermediate_size -> hidden_size, stored as (K, N).
    w = initializer_range * jax.random.normal(
        kw, (intermediate, hidden), dtype=jnp.float32)
    b = initializer_range * jax.random.normal(kb, (hidden,), dtype=jnp.float32)
    gamma = 1.0 + 0.1 * jax.random.normal(kg, (hidden,), dtype=jnp.float32)
    beta = 0.1 * jax.random.normal(kbe, (hidden,), dtype=jnp.float32)

    # Pure-JAX reference: dense -> (dropout=identity) -> LayerNorm(x + residual)
    y = jnp.einsum("bsk,kn->bsn", hidden_states, w) + b
    y = y + input_tensor
    mean = jnp.mean(y, axis=-1, keepdims=True)
    var = jnp.mean((y - mean) ** 2, axis=-1, keepdims=True)
    ref = (y - mean) * jax.lax.rsqrt(var + layer_norm_eps) * gamma + beta

    # Default (bf16 MXU operands, f32 accumulation): relaxed tolerance.
    out_bf16 = layout_output(
        hidden_states, input_tensor, w, b, gamma, beta, eps=layer_norm_eps)
    out_bf16 = jax.block_until_ready(out_bf16)
    assert out_bf16.shape == (batch, seq, hidden)
    assert jnp.allclose(out_bf16, ref, atol=1e-2, rtol=1e-2), (
        float(jnp.max(jnp.abs(out_bf16 - ref))))

    # Full-f32 path: tight tolerance check.
    out_f32 = layout_output(
        hidden_states, input_tensor, w, b, gamma, beta,
        eps=layer_norm_eps, use_bf16_matmul=False)
    out_f32 = jax.block_until_ready(out_f32)
    assert jnp.allclose(out_f32, ref, atol=1e-5, rtol=1e-5), (
        float(jnp.max(jnp.abs(out_f32 - ref))))

    print("KERNEL_OK")
</pallas_src>

<mosaic_0001>
module attributes {stable_mosaic.version = 11 : i64} {
  func.func @_resident_kernel(%arg0: i32, %arg1: memref<16x64xbf16, #tpu.memory_space<vmem>>, %arg2: memref<64x32xbf16, #tpu.memory_space<vmem>>, %arg3: memref<3x32xf32, #tpu.memory_space<vmem>>, %arg4: memref<16x32xf32, #tpu.memory_space<vmem>>, %arg5: memref<16x32xf32, #tpu.memory_space<vmem>>) attributes {dimension_semantics = [#tpu.dimension_semantics<parallel>], iteration_bounds = array<i64: 1>, scalar_prefetch = 0 : i64, scratch_operands = 0 : i64, tpu.core_type = #tpu.core_type<tc>, window_params = [{transform_indices = @transform_0, window_bounds = array<i64: 16, 64>}, {pipeline_mode = #tpu.pipeline_mode<synchronous>, transform_indices = @transform_1, window_bounds = array<i64: 64, 32>}, {pipeline_mode = #tpu.pipeline_mode<synchronous>, transform_indices = @transform_2, window_bounds = array<i64: 3, 32>}, {transform_indices = @transform_3, window_bounds = array<i64: 16, 32>}, {transform_indices = @transform_4, window_bounds = array<i64: 16, 32>}]} {
    %c0 = arith.constant 0 : index
    %c0_0 = arith.constant 0 : index
    %0 = vector.load %arg1[%c0, %c0_0] : memref<16x64xbf16, #tpu.memory_space<vmem>>, vector<16x64xbf16>
    %c0_1 = arith.constant 0 : index
    %c0_2 = arith.constant 0 : index
    %1 = vector.load %arg2[%c0_1, %c0_2] : memref<64x32xbf16, #tpu.memory_space<vmem>>, vector<64x32xbf16>
    %cst = arith.constant dense<0.000000e+00> : vector<16x32xf32>
    %2 = tpu.matmul %0, %1, %cst {dimension_numbers = #tpu.dot_dimension_numbers<[1], [0], [0], [1], [0, 0, 1, 1], [], []>} : vector<16x64xbf16>, vector<64x32xbf16>, vector<16x32xf32> -> vector<16x32xf32>
    %c0_3 = arith.constant 0 : index
    %c0_4 = arith.constant 0 : index
    %3 = vector.load %arg3[%c0_3, %c0_4] : memref<3x32xf32, #tpu.memory_space<vmem>>, vector<1x32xf32>
    %4 = vector.broadcast %3 : vector<1x32xf32> to vector<16x32xf32>
    %5 = arith.addf %2, %4 : vector<16x32xf32>
    %c0_5 = arith.constant 0 : index
    %c0_6 = arith.constant 0 : index
    %6 = vector.load %arg4[%c0_5, %c0_6] : memref<16x32xf32, #tpu.memory_space<vmem>>, vector<16x32xf32>
    %7 = arith.addf %5, %6 : vector<16x32xf32>
    %cst_7 = arith.constant dense<0.000000e+00> : vector<16xf32>
    %8 = vector.multi_reduction <add>, %7, %cst_7 [1] : vector<16x32xf32> to vector<16xf32>
    %9 = vector.shape_cast %8 : vector<16xf32> to vector<16x1xf32>
    %cst_8 = arith.constant 3.200000e+01 : f32
    %10 = vector.broadcast %cst_8 : f32 to vector<16x1xf32>
    %11 = arith.divf %9, %10 : vector<16x1xf32>
    %12 = vector.broadcast %11 : vector<16x1xf32> to vector<16x32xf32>
    %13 = arith.subf %7, %12 : vector<16x32xf32>
    %14 = arith.mulf %13, %13 : vector<16x32xf32>
    %cst_9 = arith.constant dense<0.000000e+00> : vector<16xf32>
    %15 = vector.multi_reduction <add>, %14, %cst_9 [1] : vector<16x32xf32> to vector<16xf32>
    %16 = vector.shape_cast %15 : vector<16xf32> to vector<16x1xf32>
    %cst_10 = arith.constant 3.200000e+01 : f32
    %17 = vector.broadcast %cst_10 : f32 to vector<16x1xf32>
    %18 = arith.divf %16, %17 : vector<16x1xf32>
    %cst_11 = arith.constant 9.99999996E-13 : f32
    %19 = vector.broadcast %cst_11 : f32 to vector<16x1xf32>
    %20 = arith.addf %18, %19 : vector<16x1xf32>
    %21 = math.rsqrt %20 : vector<16x1xf32>
    %22 = vector.broadcast %21 : vector<16x1xf32> to vector<16x32xf32>
    %23 = arith.mulf %13, %22 : vector<16x32xf32>
    %c1 = arith.constant 1 : index
    %c0_12 = arith.constant 0 : index
    %24 = vector.load %arg3[%c1, %c0_12] : memref<3x32xf32, #tpu.memory_space<vmem>>, vector<1x32xf32>
    %25 = vector.broadcast %24 : vector<1x32xf32> to vector<16x32xf32>
    %26 = arith.mulf %23, %25 : vector<16x32xf32>
    %c2 = arith.constant 2 : index
    %c0_13 = arith.constant 0 : index
    %27 = vector.load %arg3[%c2, %c0_13] : memref<3x32xf32, #tpu.memory_space<vmem>>, vector<1x32xf32>
    %28 = vector.broadcast %27 : vector<1x32xf32> to vector<16x32xf32>
    %29 = arith.addf %26, %28 : vector<16x32xf32>
    %c0_14 = arith.constant 0 : index
    %c0_15 = arith.constant 0 : index
    %30 = vector.load %arg5[%c0_14, %c0_15] : memref<16x32xf32, #tpu.memory_space<vmem>>, vector<16x32xf32>
    tpu.vector_store %arg5[%c0_14, %c0_15], %29 {strides = array<i32>} : memref<16x32xf32, #tpu.memory_space<vmem>>, vector<16x32xf32>,
    return
  }
  func.func @transform_0(%arg0: i32) -> (i32, i32) {
    %c0_i32 = arith.constant 0 : i32
    %c0_i32_0 = arith.constant 0 : i32
    return %arg0, %c0_i32 : i32, i32
  }
  func.func @transform_1(%arg0: i32) -> (i32, i32) {
    %c0_i32 = arith.constant 0 : i32
    %c0_i32_0 = arith.constant 0 : i32
    %c0_i32_1 = arith.constant 0 : i32
    return %c0_i32, %c0_i32_0 : i32, i32
  }
  func.func @transform_2(%arg0: i32) -> (i32, i32) {
    %c0_i32 = arith.constant 0 : i32
    %c0_i32_0 = arith.constant 0 : i32
    %c0_i32_1 = arith.constant 0 : i32
    return %c0_i32, %c0_i32_0 : i32, i32
  }
  func.func @transform_3(%arg0: i32) -> (i32, i32) {
    %c0_i32 = arith.constant 0 : i32
    %c0_i32_0 = arith.constant 0 : i32
    return %arg0, %c0_i32 : i32, i32
  }
  func.func @transform_4(%arg0: i32) -> (i32, i32) {
    %c0_i32 = arith.constant 0 : i32
    %c0_i32_0 = arith.constant 0 : i32
    return %arg0, %c0_i32 : i32, i32
  }
}

</mosaic_0001>

<bundles_post_ra>
// kernel: tpu_custom_call.1
= control target key start
LH: loop header
LB: loop body
LE: loop exit
PB: predicated region body
PF: predicated region fallthrough
CT: control target
= control target key end

     0   :  { %v236_v1 = vmov 0.0   ;;  %vm237_vm0 = vmmov 0   ;;  %s314_s0 = inlined_call_operand.vmem [shape: bf16[16,64], index: 0, kind: input, shape index: {}]   ;;  %s315_s1 = inlined_call_operand.vmem [shape: bf16[64,32], index: 1, kind: input, shape index: {}]   ;;  %s316_s2 = inlined_call_operand.vmem [shape: f32[3,32], index: 2, kind: input, shape index: {}]   ;;  %s317_s3 = inlined_call_operand.vmem [shape: f32[16,32], index: 3, kind: input, shape index: {}]   ;;  %s318_s4 = inlined_call_operand.hbm [shape: f32[16,32], index: 4, kind: output, shape index: {}]  }
   0x1   :  { %v203_v0 = vld [vmem:[%s315_s1] sm:$0xff]   ;;  %186 = vmatprep.subr.bf16.mxu0 %v236_v1  ;;  %v204_v2 = vld [vmem:[%s315_s1 + $0x8] sm:$0xff]   ;;  %194 = vmatprep.mubr.msk.bf16.mxu0 %vm237_vm0, %v236_v1 }
   0x2   :  { %187 = vmatpush3.bf16.msra.mxu0 %v203_v0 }
   0x3   :  { %188 = vmatprep.subr.bf16.mxu0 %v236_v1 }
   0x4   :  { %9 = vsyncpa [#allocation3], 0  ;;  %v205_v3 = vld [vmem:[%s315_s1 + $0x10] sm:$0xff]   ;;  %v206_v4 = vld [vmem:[%s315_s1 + $0x18] sm:$0xff]   ;;  %vm63_vm1 = vcmask 523264   ;;  %vm112_vm2 = vcmask 261120  }
   0x5   :  { %v207_v5 = vld [vmem:[%s314_s0] sm:$0xff]   ;;  %v109_v12 = vld [vmem:[%s317_s3 + $0x8] sm:$0xff]  ;;  %s238_s6 = smov [#allocation2]  }
   0x6   :  { %189 = vmatpush3.bf16.msra.mxu0 %v204_v2  ;;  %v172_v6 = vld [vmem:[%s316_s2] ss:$0 sm:$0xff]  ;;  %v179_v36 = vld [vmem:[%s316_s2 + $0x1] ss:$0 sm:$0xff]  ;;  %v180_v38 = vld [vmem:[%s316_s2 + $0x2] ss:$0 sm:$0xff] }
   0x7   :  { %190 = vmatprep.subr.bf16.mxu0 %v236_v1  ;;  %v108_v8 = vld [vmem:[%s317_s3] sm:$0xff]  ;;  %s161_s7 = sshll.u32 %s238_s6, 4  ;;  %s162_s7 = int_to_ptr.vmem [resolvable:$true] %s161_s7 }
   0x8   :  { %s212_s8 = scalar_lea.vmem %s162_s7, 256  ;;  %p217_p1 = scmp.lt.s32.totalorder %s162_s7, %s162_s7 }
   0x9   :  { %p213_p0 = scmp.ne.s32.totalorder %s162_s7, %s212_s8  ;;  %p218_p2 = scmp.lt.s32.totalorder %s212_s8, %s212_s8 }
   0xa   :  { %191 = vmatpush3.bf16.msra.mxu0 %v205_v3 }
   0xb   :  { %192 = vmatprep.subr.bf16.mxu0 %v236_v1  ;;  %p219_p3 = por %p218_p2, %p217_p1 }
   0xd   :  { %p220_p4 = pnand %p219_p3, %p213_p0 }
   0xe   :  { %193 = vmatpush3.bf16.msra.mxu0 %v206_v4 }
  0x11   :  { %195 = vmatmul.mubr.msk.bf16.vlgmr.msra.gmra.mrb[0].mxu0 %vm63_vm1, %v207_v5 }
  0xe4   :  { %v101_v7 = vpop.f32.mrb[0].mxu0 }
  0xe5   :  { %v102_v9 = vadd.f32 %v172_v6, %v101_v7  ;;  %v196_v10 = vpop.f32.mrb[1].mxu0 }
  0xe6   :  { %v104_v11 = vpop.f32.mrb[2].mxu0 }
  0xe7   :  { %v105_v13 = vadd.f32 %v172_v6, %v104_v11  ;;  %v197_v14 = vpop.f32.mrb[3].mxu0  ;;  %v110_v15 = vadd.f32 %v108_v8, %v102_v9 }
  0xe9   :  { %v113_v16 = vsel %vm112_vm2, %v110_v15, 0.0  ;;  %v111_v17 = vadd.f32 %v109_v12, %v105_v13 }
  0xea   :  { %114 = vadd.xlane.f32.xlu0 %v113_v16 }
  0xeb   :  { %v116_v18 = vsel %vm112_vm2, %v111_v17, 0.0 }
  0xee   :  { %117 = vadd.xlane.f32.xlu0 %v116_v18 }
 0x177   :  { %v115_v19 = vpop.xlane.xlu0 %114 }
 0x178   :  { %v120_v20 = vmul.f32 0.03125, %v115_v19 }
 0x17a   :  { %v122_v21 = vsub.f32 %v110_v15, %v120_v20 }
 0x17b   :  { %v118_v22 = vpop.xlane.xlu0 %117 }
 0x17c   :  { %v121_v23 = vmul.f32 0.03125, %v118_v22  ;;  %v124_v24 = vmul.f32 %v122_v21, %v122_v21 }
 0x17e   :  { %v123_v25 = vsub.f32 %v111_v17, %v121_v23  ;;  %v126_v26 = vsel %vm112_vm2, %v124_v24, 0.0 }
 0x17f   :  { %127 = vadd.xlane.f32.xlu1 %v126_v26 }
 0x180   :  { %v125_v27 = vmul.f32 %v123_v25, %v123_v25 }
 0x182   :  { %v129_v28 = vsel %vm112_vm2, %v125_v27, 0.0 }
 0x183   :  { %130 = vadd.xlane.f32.xlu1 %v129_v28 }
 0x20c   :  { %v128_v29 = vpop.xlane.xlu1 %127 }
 0x20d   :  { %v132_v30 = vmul.f32 0.03125, %v128_v29 }
 0x20f   :  { %v134_v31 = vadd.f32 1e-12, %v132_v30 }
 0x210   :  { %v131_v32 = vpop.xlane.xlu1 %130 }
 0x211   :  { %208 = vrsqrt.f32 %v134_v31  ;;  %v133_v33 = vmul.f32 0.03125, %v131_v32 }
 0x213   :  { %v135_v34 = vadd.f32 1e-12, %v133_v33 }
 0x215   :  { %210 = vrsqrt.f32 %v135_v34 }
 0x21b   :  { %v209_v35 = vpop.eup %208 }
 0x21c   :  { %v138_v37 = vmul.f32 %v209_v35, %v122_v21 }
 0x21e   :  { %v145_v39 = vmul.f32 %v179_v36, %v138_v37 }
 0x21f   :  { %v211_v40 = vpop.eup %210 }
 0x220   :  { %v139_v41 = vmul.f32 %v211_v40, %v123_v25  ;;  %v152_v42 = vadd.f32 %v180_v38, %v145_v39 }
 0x222   :  { %v146_v43 = vmul.f32 %v179_v36, %v139_v41  ;;  %154 = vst.msk [vmem:[#allocation2] sm:$0xff] %vm112_vm2, %v152_v42 }
 0x224   :  { %v153_v44 = vadd.f32 %v180_v38, %v146_v43 }
 0x226   :  { %155 = vst.msk [vmem:[#allocation2 + $0x8] sm:$0xff] %vm112_vm2, %v153_v44 }
 0x227   :  { %223 = shalt.err (!%p220_p4)
}
 0x228   :  { %s224_s10 = scalar_lea.hbm %s318_s4, 256 }
 0x229   :  { %p225_p5 = scmp.ne.s32.totalorder %s318_s4, %s224_s10  ;;  %p228_p6 = scmp.lt.u32.totalorder %s224_s10, %s318_s4 }
 0x22b   :  { %p230_p7 = pnand %p228_p6, %p225_p5 }
 0x22d   :  { %233 = shalt.err (!%p230_p7)
}
 0x22e   :  { %s239_s15 = smov 128   ;;  %s240_s16 = smov 8  }
 0x22f   :  { %167 = dma.vmem_to_hbm [thread:$0]  %s162_s7, 256, %s318_s4, [#allocation3], %s239_s15, %s239_s15, %s240_s16  }
 0x230   :  { %234 = dma.done.wait [#allocation3], 256  }
 0x231   :  { %235 = vsyncadd [#allocation3], 4294967040 }
 0x232   :  { %171 = vsyncpa [#allocation3], 1 }

</bundles_post_ra>
